<compile_context>
chip_gen: v5e
topology: v5e:2x2
jax: 0.10.0
libtpu: 0.0.40
codegen_flags: <defaults>
</compile_context>

<pallas_src>
import jax
import jax.numpy as jnp
from jax.experimental import pallas as pl
from jax.experimental.pallas import tpu as pltpu

OBS_DIM = 4
ACT_DIM = 2
IN_DIM = OBS_DIM + ACT_DIM
N_HIDDEN = 32
OUT_DIM = 4


def _round_up(x, m):
    return ((x + m - 1) // m) * m


def mlp_kernel(x_ref, w1_ref, b1_ref, w2_ref, b2_ref, w3_ref, b3_ref,
               wo_ref, bo_ref, o_ref):
    # Feature-major: x is [in, tb]; weights are PyTorch-layout [out, in]; the
    # batch lives on the lane axis so every intermediate is a dense vreg slab.
    x = x_ref[...]
    cdt = x.dtype  # io/compute dtype (f32 or bf16); accumulation is always f32.
    h = jnp.dot(w1_ref[...], x, preferred_element_type=jnp.float32) + b1_ref[...]
    h = jnp.maximum(h, 0.0).astype(cdt)
    h = jnp.dot(w2_ref[...], h, preferred_element_type=jnp.float32) + b2_ref[...]
    h = jnp.maximum(h, 0.0).astype(cdt)
    h = jnp.dot(w3_ref[...], h, preferred_element_type=jnp.float32) + b3_ref[...]
    h = jnp.maximum(h, 0.0).astype(cdt)
    # Output block is [OUT_DIM, tb]: lane-dense, full-width stores.
    o_ref[...] = (jnp.dot(wo_ref[...], h, preferred_element_type=jnp.float32)
                  + bo_ref[...]).astype(o_ref.dtype)


def network_forward(obs, actions, params, *, batch_tile=1024, min_grid_batch=2048,
                    dtype=jnp.float32):
    """obs: [B, 4], actions: [B, 2] -> [B, 4] in `dtype` (f32 default, bf16 ok)."""
    w1, b1, w2, b2, w3, b3, wo, bo = params
    B = obs.shape[0]

    # One fused concat+transpose builds the feature-major input [6, B].
    # Callers that already hold feature-major data can pass it straight through.
    x_t = jnp.concatenate([obs.astype(dtype), actions.astype(dtype)], axis=1).T

    # Weights in PyTorch layout [out, in]; biases reshaped to [out, 1] columns and
    # kept f32 (they are added on the f32 accumulator output).
    wts = tuple(w.astype(dtype) for w in (w1, w2, w3, wo))
    bss = tuple(b.reshape(-1, 1).astype(jnp.float32) for b in (b1, b2, b3, bo))
    args = (x_t, wts[0], bss[0], wts[1], bss[1], wts[2], bss[2], wts[3], bss[3])

    itemsize = jnp.dtype(dtype).itemsize
    flops = 2 * B * (IN_DIM * N_HIDDEN + 2 * N_HIDDEN * N_HIDDEN + N_HIDDEN * OUT_DIM)
    param_bytes = itemsize * (N_HIDDEN * IN_DIM + 2 * N_HIDDEN * N_HIDDEN
                              + OUT_DIM * N_HIDDEN) + 4 * (3 * N_HIDDEN + OUT_DIM)
    cost = pl.CostEstimate(
        flops=int(flops), transcendentals=0,
        bytes_accessed=int(B * (IN_DIM + OUT_DIM) * itemsize + param_bytes))

    if B <= max(min_grid_batch, batch_tile):
        # Small/medium batch: one invocation, everything VMEM-resident (a grid
        # step costs ~0.35 us, which would dominate this tiny MLP at small B).
        vmem = pl.BlockSpec(memory_space=pltpu.MemorySpace.VMEM)
        out_t = pl.pallas_call(
            mlp_kernel,
            out_shape=jax.ShapeDtypeStruct((OUT_DIM, B), dtype),
            in_specs=[vmem] * 9,
            out_specs=vmem,
            cost_estimate=cost,
        )(*args)
        return out_t.T

    # Large batch: grid over the lane/batch axis with auto double-buffering.
    # Tile is a multiple of 128 (lane-dense blocks) capped so num_tiles >= 2,
    # letting the "parallel" axis feed both TensorCores on v7x.
    batch_tile = max(128, _round_up(batch_tile, 128))
    tb = max(128, min(batch_tile, _round_up(-(-B // 2), 128)))
    num_tiles = -(-B // tb)  # ragged last block handled by Pallas (OOB writes dropped)

    def resident(shape):
        # Same block at every grid step -> stays resident in VMEM.
        return pl.BlockSpec(shape, lambda i: (0, 0))

    # VMEM per double-buffered block at tb=1024/f32: x ~24 KiB, out ~16 KiB,
    # weights ~9 KiB total -> far under scoped limits on v5e/v6e/v7x.
    out_t = pl.pallas_call(
        mlp_kernel,
        out_shape=jax.ShapeDtypeStruct((OUT_DIM, B), dtype),
        grid=(num_tiles,),
        in_specs=[
            pl.BlockSpec((IN_DIM, tb), lambda i: (0, i)),
            resident((N_HIDDEN, IN_DIM)),
            resident((N_HIDDEN, 1)),
            resident((N_HIDDEN, N_HIDDEN)),
            resident((N_HIDDEN, 1)),
            resident((N_HIDDEN, N_HIDDEN)),
            resident((N_HIDDEN, 1)),
            resident((OUT_DIM, N_HIDDEN)),
            resident((OUT_DIM, 1)),
        ],
        out_specs=pl.BlockSpec((OUT_DIM, tb), lambda i: (0, i)),
        compiler_params=pltpu.CompilerParams(
            dimension_semantics=("parallel",),  # independent batch tiles
        ),
        cost_estimate=cost,
    )(*args)
    # Transpose back to the PyTorch [B, 4] convention; consumers that accept
    # feature-major output can use out_t directly and skip this copy.
    return out_t.T


def init_params(key):
    """Deterministic init mimicking nn.Linear defaults (uniform +/- 1/sqrt(fan_in)).
    Weights are stored exactly like PyTorch: [out_features, in_features]."""
    dims = [(IN_DIM, N_HIDDEN), (N_HIDDEN, N_HIDDEN),
            (N_HIDDEN, N_HIDDEN), (N_HIDDEN, OUT_DIM)]
    params = []
    for fan_in, fan_out in dims:
        key, kw, kb = jax.random.split(key, 3)
        bound = 1.0 / jnp.sqrt(jnp.float32(fan_in))
        w = jax.random.uniform(kw, (fan_out, fan_in), jnp.float32, -bound, bound)
        b = jax.random.uniform(kb, (fan_out,), jnp.float32, -bound, bound)
        params += [w, b]
    return tuple(params)


def ref_forward(obs, actions, params):
    x = jnp.concatenate([obs, actions], axis=1)
    w1, b1, w2, b2, w3, b3, wo, bo = params
    h = jnp.maximum(x @ w1.T + b1, 0.0)
    h = jnp.maximum(h @ w2.T + b2, 0.0)
    h = jnp.maximum(h @ w3.T + b3, 0.0)
    return h @ wo.T + bo


if __name__ == "__main__":
    key = jax.random.PRNGKey(0)
    key, k_obs, k_act = jax.random.split(key, 3)
    params = init_params(key)

    # --- Small-batch fast path (single invocation, no grid) ---
    B = 8
    obs = jax.random.normal(k_obs, (B, OBS_DIM), jnp.float32)
    actions = jax.random.normal(k_act, (B, ACT_DIM), jnp.float32)
    out = jax.block_until_ready(network_forward(obs, actions, params))
    ref = ref_forward(obs, actions, params)
    assert out.shape == (B, OUT_DIM)
    assert jnp.allclose(out, ref, atol=1e-4, rtol=1e-4)

    # --- Gridded path with ragged last tile (600 % 256 != 0), no pad/slice ---
    B2 = 600
    key, k2o, k2a = jax.random.split(key, 3)
    obs2 = jax.random.normal(k2o, (B2, OBS_DIM), jnp.float32)
    actions2 = jax.random.normal(k2a, (B2, ACT_DIM), jnp.float32)
    out2 = jax.block_until_ready(
        network_forward(obs2, actions2, params, batch_tile=256, min_grid_batch=256))
    ref2 = ref_forward(obs2, actions2, params)
    assert out2.shape == (B2, OUT_DIM)
    assert jnp.allclose(out2, ref2, atol=1e-4, rtol=1e-4)

    # --- bf16 I/O path (f32 accumulation in-kernel), gridded + ragged ---
    out3 = jax.block_until_ready(
        network_forward(obs2, actions2, params, batch_tile=128, min_grid_batch=128,
                        dtype=jnp.bfloat16))
    assert out3.shape == (B2, OUT_DIM)
    assert jnp.allclose(out3.astype(jnp.float32), ref2, atol=0.1, rtol=0.1)

    print("KERNEL_OK")
</pallas_src>

<mosaic_0001>
module attributes {stable_mosaic.version = 11 : i64} {
  func.func @mlp_kernel(%arg0: memref<6x8xf32, #tpu.memory_space<vmem>>, %arg1: memref<32x6xf32, #tpu.memory_space<vmem>>, %arg2: memref<32x1xf32, #tpu.memory_space<vmem>>, %arg3: memref<32x32xf32, #tpu.memory_space<vmem>>, %arg4: memref<32x1xf32, #tpu.memory_space<vmem>>, %arg5: memref<32x32xf32, #tpu.memory_space<vmem>>, %arg6: memref<32x1xf32, #tpu.memory_space<vmem>>, %arg7: memref<4x32xf32, #tpu.memory_space<vmem>>, %arg8: memref<4x1xf32, #tpu.memory_space<vmem>>, %arg9: memref<4x8xf32, #tpu.memory_space<vmem>>) attributes {dimension_semantics = [], scalar_prefetch = 0 : i64, scratch_operands = 0 : i64, tpu.core_type = #tpu.core_type<tc>} {
    %c0 = arith.constant 0 : index
    %c0_0 = arith.constant 0 : index
    %0 = vector.load %arg0[%c0, %c0_0] : memref<6x8xf32, #tpu.memory_space<vmem>>, vector<6x8xf32>
    %c0_1 = arith.constant 0 : index
    %c0_2 = arith.constant 0 : index
    %1 = vector.load %arg1[%c0_1, %c0_2] : memref<32x6xf32, #tpu.memory_space<vmem>>, vector<32x6xf32>
    %cst = arith.constant dense<0.000000e+00> : vector<32x8xf32>
    %2 = tpu.matmul %1, %0, %cst {dimension_numbers = #tpu.dot_dimension_numbers<[1], [0], [0], [1], [0, 0, 1, 1], [], []>} : vector<32x6xf32>, vector<6x8xf32>, vector<32x8xf32> -> vector<32x8xf32>
    %c0_3 = arith.constant 0 : index
    %c0_4 = arith.constant 0 : index
    %3 = vector.load %arg2[%c0_3, %c0_4] : memref<32x1xf32, #tpu.memory_space<vmem>>, vector<32x1xf32>
    %4 = vector.broadcast %3 : vector<32x1xf32> to vector<32x8xf32>
    %5 = arith.addf %2, %4 : vector<32x8xf32>
    %cst_5 = arith.constant 0.000000e+00 : f32
    %6 = vector.broadcast %cst_5 : f32 to vector<32x8xf32>
    %7 = arith.maximumf %5, %6 : vector<32x8xf32>
    %c0_6 = arith.constant 0 : index
    %c0_7 = arith.constant 0 : index
    %8 = vector.load %arg3[%c0_6, %c0_7] : memref<32x32xf32, #tpu.memory_space<vmem>>, vector<32x32xf32>
    %cst_8 = arith.constant dense<0.000000e+00> : vector<32x8xf32>
    %9 = tpu.matmul %8, %7, %cst_8 {dimension_numbers = #tpu.dot_dimension_numbers<[1], [0], [0], [1], [0, 0, 1, 1], [], []>} : vector<32x32xf32>, vector<32x8xf32>, vector<32x8xf32> -> vector<32x8xf32>
    %c0_9 = arith.constant 0 : index
    %c0_10 = arith.constant 0 : index
    %10 = vector.load %arg4[%c0_9, %c0_10] : memref<32x1xf32, #tpu.memory_space<vmem>>, vector<32x1xf32>
    %11 = vector.broadcast %10 : vector<32x1xf32> to vector<32x8xf32>
    %12 = arith.addf %9, %11 : vector<32x8xf32>
    %cst_11 = arith.constant 0.000000e+00 : f32
    %13 = vector.broadcast %cst_11 : f32 to vector<32x8xf32>
    %14 = arith.maximumf %12, %13 : vector<32x8xf32>
    %c0_12 = arith.constant 0 : index
    %c0_13 = arith.constant 0 : index
    %15 = vector.load %arg5[%c0_12, %c0_13] : memref<32x32xf32, #tpu.memory_space<vmem>>, vector<32x32xf32>
    %cst_14 = arith.constant dense<0.000000e+00> : vector<32x8xf32>
    %16 = tpu.matmul %15, %14, %cst_14 {dimension_numbers = #tpu.dot_dimension_numbers<[1], [0], [0], [1], [0, 0, 1, 1], [], []>} : vector<32x32xf32>, vector<32x8xf32>, vector<32x8xf32> -> vector<32x8xf32>
    %c0_15 = arith.constant 0 : index
    %c0_16 = arith.constant 0 : index
    %17 = vector.load %arg6[%c0_15, %c0_16] : memref<32x1xf32, #tpu.memory_space<vmem>>, vector<32x1xf32>
    %18 = vector.broadcast %17 : vector<32x1xf32> to vector<32x8xf32>
    %19 = arith.addf %16, %18 : vector<32x8xf32>
    %cst_17 = arith.constant 0.000000e+00 : f32
    %20 = vector.broadcast %cst_17 : f32 to vector<32x8xf32>
    %21 = arith.maximumf %19, %20 : vector<32x8xf32>
    %c0_18 = arith.constant 0 : index
    %c0_19 = arith.constant 0 : index
    %22 = vector.load %arg7[%c0_18, %c0_19] : memref<4x32xf32, #tpu.memory_space<vmem>>, vector<4x32xf32>
    %cst_20 = arith.constant dense<0.000000e+00> : vector<4x8xf32>
    %23 = tpu.matmul %22, %21, %cst_20 {dimension_numbers = #tpu.dot_dimension_numbers<[1], [0], [0], [1], [0, 0, 1, 1], [], []>} : vector<4x32xf32>, vector<32x8xf32>, vector<4x8xf32> -> vector<4x8xf32>
    %c0_21 = arith.constant 0 : index
    %c0_22 = arith.constant 0 : index
    %24 = vector.load %arg8[%c0_21, %c0_22] : memref<4x1xf32, #tpu.memory_space<vmem>>, vector<4x1xf32>
    %25 = vector.broadcast %24 : vector<4x1xf32> to vector<4x8xf32>
    %26 = arith.addf %23, %25 : vector<4x8xf32>
    %c0_23 = arith.constant 0 : index
    %c0_24 = arith.constant 0 : index
    %27 = vector.load %arg9[%c0_23, %c0_24] : memref<4x8xf32, #tpu.memory_space<vmem>>, vector<4x8xf32>
    tpu.vector_store %arg9[%c0_23, %c0_24], %26 {strides = array<i32>} : memref<4x8xf32, #tpu.memory_space<vmem>>, vector<4x8xf32>,
    return
  }
}

</mosaic_0001>

<bundles_post_ra>
// kernel: tpu_custom_call.1
= control target key start
LH: loop header
LB: loop body
LE: loop exit
PB: predicated region body
PF: predicated region fallthrough
CT: control target
= control target key end

     0   :  { %vm75_vm0 = vcmask 1045504   ;;  %v360_v3 = vmov 0   ;;  %vm62_vm1 = vcmask 48128   ;;  %s509_s0 = inlined_call_operand.vmem [shape: f32[6,8], index: 0, kind: input, shape index: {}]   ;;  %s510_s1 = inlined_call_operand.vmem [shape: f32[32,6], index: 1, kind: input, shape index: {}]   ;;  %s511_s2 = inlined_call_operand.vmem [shape: f32[32,1], index: 2, kind: input, shape index: {}]   ;;  %s512_s3 = inlined_call_operand.vmem [shape: f32[32,32], index: 3, kind: input, shape index: {}]   ;;  %s513_s4 = inlined_call_operand.vmem [shape: f32[32,1], index: 4, kind: input, shape index: {}]   ;;  %s514_s5 = inlined_call_operand.vmem [shape: f32[32,32], index: 5, kind: input, shape index: {}]   ;;  %s515_s6 = inlined_call_operand.vmem [shape: f32[32,1], index: 6, kind: input, shape index: {}]   ;;  %s516_s7 = inlined_call_operand.vmem [shape: f32[4,32], index: 7, kind: input, shape index: {}]   ;;  %s517_s8 = inlined_call_operand.vmem [shape: f32[4,1], index: 8, kind: input, shape index: {}]   ;;  %s518_s9 = inlined_call_operand.hbm [shape: f32[4,8], index: 9, kind: output, shape index: {}]  }
   0x1   :  { %v33_v0 = vld [vmem:[%s509_s0] sm:$0x3f]  ;;  %v41_v1 = vld [vmem:[%s511_s2 + $0x18] sm:$0xff]  ;;  %331 = vset.pattern.permute.xlu0 %v360_v3  ;;  %v39_v4 = vld [vmem:[%s511_s2 + $0x8] sm:$0xff]  ;;  %332 = vset.pattern.permute.xlu1 %v360_v3 }
   0x2   :  { %v34_v2 = vld [vmem:[%s510_s1] sm:$0xff]  ;;  %307 = vmatpush.msk.msra.mxu0 %vm75_vm0, %v33_v0  ;;  %59 = vperm.xlu0 %331, %v41_v1  }
   0x3   :  { %308 = vmatmul.msk.f32.vlgmr.msra.gmra.mxu0 %vm62_vm1, %v34_v2  ;;  %333 = vset.pattern.permute.xlu2 %v360_v3 }
   0x4   :  { %49 = vperm.xlu1 %332, %v39_v4  }
   0x5   :  { %14 = vsyncpa [#allocation3], 0  ;;  %v40_v5 = vld [vmem:[%s511_s2 + $0x10] sm:$0xff]  ;;  %v35_v6 = vld [vmem:[%s510_s1 + $0x8] sm:$0xff]  ;;  %vm140_vm2 = vcmask 261120   ;;  %s361_s11 = smov [#allocation2]  }
   0x6   :  { %v38_v7 = vld [vmem:[%s511_s2] sm:$0xff]  ;;  %v117_v8 = vld [vmem:[%s513_s4 + $0x8] sm:$0xff]  ;;  %v36_v9 = vld [vmem:[%s510_s1 + $0x10] sm:$0xff]  ;;  %s296_s12 = sshll.u32 %s361_s11, 4  ;;  %vm289_vm3 = vcmask 60416   ;;  %s297_s12 = int_to_ptr.vmem [resolvable:$true] %s296_s12 }
   0x7   :  { %v116_v10 = vld [vmem:[%s513_s4] sm:$0xff]  ;;  %v192_v11 = vld [vmem:[%s515_s6 + $0x10] sm:$0xff]  ;;  %v37_v12 = vld [vmem:[%s510_s1 + $0x18] sm:$0xff]  ;;  %s298_s1 = sshll.u32 %s518_s9, 4  ;;  %s299_s1 = int_to_ptr.hbm [resolvable:$true] %s298_s1 }
   0x8   :  { %v191_v13 = vld [vmem:[%s515_s6 + $0x8] sm:$0xff]  ;;  %v260_v14 = vld [vmem:[%s517_s8] sm:$0xf]  ;;  %v119_v20 = vld [vmem:[%s513_s4 + $0x18] sm:$0xff] }
   0x9   :  { %137 = vperm.xlu2 %333, %v119_v20   ;;  %v118_v28 = vld [vmem:[%s513_s4 + $0x10] sm:$0xff]  ;;  %v112_v33 = vld [vmem:[%s512_s3] sm:$0xff]  ;;  %v115_v34 = vld [vmem:[%s512_s3 + $0x18] sm:$0xff] }
   0xa   :  { %54 = vperm.xlu0 %331, %v40_v5   ;;  %v193_v35 = vld [vmem:[%s515_s6 + $0x18] sm:$0xff]  ;;  %v113_v36 = vld [vmem:[%s512_s3 + $0x8] sm:$0xff]  ;;  %v190_v37 = vld [vmem:[%s515_s6] sm:$0xff] }
   0xb   :  { %309 = vmatmul.msk.f32.gmra.mxu0 %vm62_vm1, %v35_v6  ;;  %v114_v38 = vld [vmem:[%s512_s3 + $0x10] sm:$0xff]  ;;  %v186_v55 = vld [vmem:[%s514_s5] sm:$0xff]  ;;  %v189_v56 = vld [vmem:[%s514_s5 + $0x18] sm:$0xff] }
   0xc   :  { %44 = vperm.xlu1 %332, %v38_v7   ;;  %v187_v57 = vld [vmem:[%s514_s5 + $0x8] sm:$0xff]  ;;  %v188_v58 = vld [vmem:[%s514_s5 + $0x10] sm:$0xff] }
  0x11   :  { %132 = vperm.xlu2 %333, %v118_v28  }
  0x12   :  { %127 = vperm.xlu0 %331, %v117_v8  }
  0x13   :  { %310 = vmatmul.msk.f32.gmra.mxu0 %vm62_vm1, %v36_v9 }
  0x14   :  { %122 = vperm.xlu1 %332, %v116_v10  }
  0x19   :  { %211 = vperm.xlu2 %333, %v193_v35  }
  0x1a   :  { %206 = vperm.xlu0 %331, %v192_v11   ;;  %v259_v11 = vld [vmem:[%s516_s7] sm:$0xf] }
  0x1b   :  { %311 = vmatmul.msk.f32.gmra.mxu0 %vm62_vm1, %v37_v12 }
  0x1c   :  { %201 = vperm.xlu1 %332, %v191_v13  }
  0x21   :  { %196 = vperm.xlu2 %333, %v190_v37  }
  0x22   :  { %263 = vperm.xlu0 %331, %v260_v14  }
  0x63   :  { %v138_v40 = vpop.permute.xlu2 %137 }
  0x6b   :  { %v133_v46 = vpop.permute.xlu2 %132 }
  0x73   :  { %v212_v59 = vpop.permute.xlu2 %211 }
  0x74   :  { %v60_v17 = vpop.permute.xlu0 %59 }
  0x76   :  { %v50_v18 = vpop.permute.xlu1 %49 }
  0x7b   :  { %v197_v6 = vpop.permute.xlu2 %196 }
  0x7c   :  { %v55_v21 = vpop.permute.xlu0 %54 }
  0x7e   :  { %v45_v25 = vpop.permute.xlu1 %44 }
  0x80   :  { %v96_v15 = vpop.f32.mrf.mxu0 }
  0x81   :  { %v97_v29 = vadd.f32 %v96_v15, %v45_v25 }
  0x83   :  { %v108_v32 = vmax.f32 %v97_v29, 0.0 }
  0x84   :  { %v128_v45 = vpop.permute.xlu0 %127 }
  0x86   :  { %v123_v50 = vpop.permute.xlu1 %122 }
  0x88   :  { %v99_v16 = vpop.f32.mrf.mxu0 }
  0x89   :  { %v100_v26 = vadd.f32 %v99_v16, %v50_v18 }
  0x8b   :  { %v109_v31 = vmax.f32 %v100_v26, 0.0 }
  0x8c   :  { %v207_v1 = vpop.permute.xlu0 %206 }
  0x8e   :  { %v202_v2 = vpop.permute.xlu1 %201 }
  0x90   :  { %v102_v19 = vpop.f32.mrf.mxu0 }
  0x91   :  { %v103_v23 = vadd.f32 %v102_v19, %v55_v21 }
  0x93   :  { %v110_v30 = vmax.f32 %v103_v23, 0.0 }
  0x94   :  { %v264_v12 = vpop.permute.xlu0 %263 }
  0x98   :  { %v105_v22 = vpop.f32.mrf.mxu0 }
  0x99   :  { %v106_v24 = vadd.f32 %v105_v22, %v60_v17 }
  0x9b   :  { %v111_v27 = vmax.f32 %v106_v24, 0.0 }
  0x9d   :  { %165 = vmatpush.msra.mxu1 %v111_v27  ;;  %321 = vmatpush.msra.mxu3 %v111_v27 }
  0x9f   :  { %166 = vmatpush.msra.mxu1 %v110_v30  ;;  %322 = vmatpush.msra.mxu3 %v110_v30 }
  0xa1   :  { %167 = vmatpush.msra.mxu1 %v109_v31  ;;  %323 = vmatpush.msra.mxu3 %v109_v31 }
  0xa3   :  { %168 = vmatpush.msra.mxu1 %v108_v32  ;;  %324 = vmatpush.msra.mxu3 %v108_v32 }
  0xa4   :  { %312 = vmatmul.msk.f32.vlgmr.msra.gmra.mxu1 %vm140_vm2, %v112_v33  ;;  %315 = vmatmul.msk.f32.vlgmr.msra.gmra.mxu3 %vm140_vm2, %v115_v34 }
  0xac   :  { %313 = vmatmul.msk.f32.gmra.mxu1 %vm140_vm2, %v113_v36 }
  0xb4   :  { %314 = vmatmul.msk.f32.gmra.mxu1 %vm140_vm2, %v114_v38 }
 0x121   :  { %v170_v39 = vpop.f32.mrf.mxu1 }
 0x122   :  { %v171_v51 = vadd.f32 %v170_v39, %v123_v50 }
 0x124   :  { %v182_v54 = vmax.f32 %v171_v51, 0.0 }
 0x127   :  { %v179_v41 = vpop.f32.mrf.mxu3 }
 0x128   :  { %v180_v42 = vadd.f32 %v179_v41, %v138_v40 }
 0x129   :  { %v173_v43 = vpop.f32.mrf.mxu1 }
 0x12a   :  { %v185_v44 = vmax.f32 %v180_v42, 0.0  ;;  %v174_v48 = vadd.f32 %v173_v43, %v128_v45 }
 0x12c   :  { %238 = vmatpush.msra.mxu2 %v185_v44  ;;  %325 = vmatpush.msrb.mxu3 %v185_v44  ;;  %v183_v53 = vmax.f32 %v174_v48, 0.0 }
 0x131   :  { %v176_v47 = vpop.f32.mrf.mxu1 }
 0x132   :  { %v177_v49 = vadd.f32 %v176_v47, %v133_v46 }
 0x134   :  { %v184_v52 = vmax.f32 %v177_v49, 0.0 }
 0x136   :  { %239 = vmatpush.msra.mxu2 %v184_v52  ;;  %326 = vmatpush.msrb.mxu3 %v184_v52 }
 0x138   :  { %240 = vmatpush.msra.mxu2 %v183_v53  ;;  %327 = vmatpush.msrb.mxu3 %v183_v53 }
 0x13a   :  { %241 = vmatpush.msra.mxu2 %v182_v54  ;;  %328 = vmatpush.msrb.mxu3 %v182_v54 }
 0x13b   :  { %316 = vmatmul.msk.f32.vlgmr.msra.gmra.mxu2 %vm140_vm2, %v186_v55  ;;  %319 = vmatmul.msk.f32.vlgmr.msrb.gmra.mxu3 %vm140_vm2, %v189_v56 }
 0x143   :  { %317 = vmatmul.msk.f32.gmra.mxu2 %vm140_vm2, %v187_v57 }
 0x14b   :  { %318 = vmatmul.msk.f32.gmra.mxu2 %vm140_vm2, %v188_v58 }
 0x1be   :  { %v243_v60 = vpop.f32.mrf.mxu2  ;;  %v252_v61 = vpop.f32.mrf.mxu3 }
 0x1bf   :  { %v253_v62 = vadd.f32 %v252_v61, %v212_v59  ;;  %v244_v7 = vadd.f32 %v243_v60, %v197_v6 }
 0x1c1   :  { %v258_v63 = vmax.f32 %v253_v62, 0.0  ;;  %v255_v10 = vmax.f32 %v244_v7, 0.0 }
 0x1c3   :  { %281 = vmatpush.msra.mxu3 %v258_v63 }
 0x1c6   :  { %v246_v0 = vpop.f32.mrf.mxu2 }
 0x1c7   :  { %v247_v4 = vadd.f32 %v246_v0, %v202_v2 }
 0x1c9   :  { %v256_v9 = vmax.f32 %v247_v4, 0.0 }
 0x1ce   :  { %v249_v3 = vpop.f32.mrf.mxu2 }
 0x1cf   :  { %v250_v5 = vadd.f32 %v249_v3, %v207_v1 }
 0x1d1   :  { %v257_v8 = vmax.f32 %v250_v5, 0.0 }
 0x1d3   :  { %282 = vmatpush.msra.mxu3 %v257_v8 }
 0x1d5   :  { %283 = vmatpush.msra.mxu3 %v256_v9 }
 0x1d7   :  { %284 = vmatpush.msra.mxu3 %v255_v10 }
 0x1d8   :  { %320 = vmatmul.msk.f32.vlgmr.msra.gmra.mxu3 %vm140_vm2, %v259_v11 }
 0x25b   :  { %v286_v13 = vpop.f32.mrf.mxu3 }
 0x25c   :  { %v287_v14 = vadd.f32 %v286_v13, %v264_v12 }
 0x25e   :  { %290 = vst.msk [vmem:[#allocation2] sm:$0xf] %vm289_vm3, %v287_v14 }
 0x25f   :  { %301 = dma.vmem_to_hbm [thread:$0]  %s297_s12, 64, %s299_s1, [#allocation3]  }
 0x260   :  { %358 = dma.done.wait [#allocation3], 64  }
 0x261   :  { %359 = vsyncadd [#allocation3], 4294967232 }
 0x262   :  { %306 = vsyncpa [#allocation3], 1 }

</bundles_post_ra>
